<compile_context>
chip_gen: v7x
topology: tpu7x:2x2x1
jax: 0.10.0
libtpu: 0.0.40
codegen_flags: <defaults>
</compile_context>

<pallas_src>
import functools

import numpy as np
import jax
import jax.numpy as jnp
from jax.experimental import pallas as pl
from jax.experimental.pallas import tpu as pltpu


def _round_up(x: int, m: int) -> int:
    return ((x + m - 1) // m) * m


@functools.lru_cache(maxsize=None)
def _bilinear_resize_matrix_np(in_size: int, out_size: int) -> np.ndarray:
    """(out_size, in_size) host matrix == torch bilinear resize
    (align_corners=False, antialias=False)."""
    d = np.arange(out_size, dtype=np.float64)
    scale = in_size / out_size
    src = (d + 0.5) * scale - 0.5
    src = np.maximum(src, 0.0)
    i0 = np.minimum(np.floor(src).astype(np.int64), in_size - 1)
    i1 = np.minimum(i0 + 1, in_size - 1)
    w1 = src - i0
    w0 = 1.0 - w1
    m = np.zeros((out_size, in_size), np.float32)
    rows = np.arange(out_size)
    np.add.at(m, (rows, i0), w0)
    np.add.at(m, (rows, i1), w1)
    return m


def _resize_output_size(h: int, w: int, size: int):
    """torchvision F.resize with a single-int size: shorter edge -> size."""
    short, long = (h, w) if h <= w else (w, h)
    new_short = size
    new_long = int(size * long / short)
    return (new_short, new_long) if h <= w else (new_long, new_short)


def _make_kernel(Bt, C, H, W, crop_h_pad, crop_w_pad, mean, inv_std,
                 out_dtype, big_m):
    """Per-block kernel. All shape / ordering decisions are trace-time."""

    def kernel(img_ref, wh_ref, wwt_ref, out_ref):
        # img_ref : (Bt, C, H, W)                    f32   (cast to bf16 here)
        # wh_ref  : (crop_h_pad, H)                  bf16  row interp (crop folded)
        # wwt_ref : (W, crop_w_pad)                  bf16  col interp, transposed
        # out_ref : (Bt, C, crop_h_pad, crop_w_pad)  out_dtype (lane-dense)
        wh = wh_ref[...]
        wwt = wwt_ref[...]

        def store(b, c, y):
            # Normalize the full padded tile and store it whole: unmasked,
            # lane-dense vector stores (pad region is sliced off in the wrapper).
            out_ref[b, c] = ((y - mean[c]) * inv_std[c]).astype(out_dtype)

        if big_m:
            # H is sublane-aligned: collapse (Bt, C, H) into one big-M matmul
            # so the column interpolation fills the MXU and wwt is pushed once.
            x2 = img_ref[...].reshape(Bt * C * H, W).astype(jnp.bfloat16)
            t = jnp.dot(x2, wwt, preferred_element_type=jnp.float32)
            for b in range(Bt):
                for c in range(C):
                    n = b * C + c
                    tc = t[n * H:(n + 1) * H, :].astype(jnp.bfloat16)  # aligned slice
                    store(b, c, jnp.dot(wh, tc,
                                        preferred_element_type=jnp.float32))
        else:
            # Unaligned H: per-(image, channel) 2-D matmuls (robust lowering;
            # this kernel is HBM-bound, so the extra weight pushes are hidden).
            for b in range(Bt):
                for c in range(C):
                    xc = img_ref[b, c].astype(jnp.bfloat16)            # (H, W)
                    tc = jnp.dot(xc, wwt,
                                 preferred_element_type=jnp.float32
                                 ).astype(jnp.bfloat16)
                    store(b, c, jnp.dot(wh, tc,
                                        preferred_element_type=jnp.float32))

    return kernel


def image_classification_forward(
    img,
    *,
    crop_size: int,
    resize_size: int = 256,
    mean=(0.485, 0.456, 0.406),
    std=(0.229, 0.224, 0.225),
    out_dtype=jnp.float32,
    pad_output: bool = False,
):
    """img: (B, C, H, W) float in [0, 1] (convert_image_dtype is identity).

    pad_output=True returns the lane-dense (B, C, crop_h_pad, crop_w_pad)
    layout directly (avoids the wrapper slice copy when downstream can
    consume padded outputs)."""
    B, C, H, W = img.shape
    new_h, new_w = _resize_output_size(H, W, resize_size)
    crop_h = crop_w = int(crop_size)

    # torchvision center-crop offsets.
    top = int(round((new_h - crop_h) / 2.0))
    left = int(round((new_w - crop_w) / 2.0))
    assert top >= 0 and left >= 0, "crop larger than resized image not supported"

    wh_np = _bilinear_resize_matrix_np(H, new_h)[top: top + crop_h]    # (crop_h, H)
    ww_np = _bilinear_resize_matrix_np(W, new_w)[left: left + crop_w]  # (crop_w, W)

    # Pad crop dims to (8, 128) alignment; zero rows/cols keep MXU tiles full
    # and make the output block lane-dense. The pad region is sliced off below.
    crop_h_pad = _round_up(crop_h, 8)
    crop_w_pad = _round_up(crop_w, 128)
    wh_pad = np.zeros((crop_h_pad, H), np.float32)
    wh_pad[:crop_h] = wh_np
    wwt_pad = np.zeros((W, crop_w_pad), np.float32)
    wwt_pad[:, :crop_w] = ww_np.T

    mean_f = tuple(float(m) for m in mean)
    inv_std_f = tuple(1.0 / float(s) for s in std)
    assert len(mean_f) == C and len(inv_std_f) == C

    out_itemsize = int(np.dtype(out_dtype).itemsize)
    out_sub = 8 if out_itemsize >= 4 else 16
    Kp, Wp = crop_h_pad, crop_w_pad
    H8 = _round_up(H, 8)        # f32 sublane padding of the input block
    Wl = _round_up(W, 128)      # lane padding of the input block
    wts_bytes = (_round_up(Kp, 16) * _round_up(H, 128)
                 + _round_up(W, 16) * Wp) * 2          # bf16, single-buffered

    def _vmem_estimate(bt: int) -> int:
        n = bt * C
        inp = 2 * n * H8 * Wl * 4                                   # f32 input, 2 bufs
        outb = 2 * n * _round_up(Kp, out_sub) * Wp * out_itemsize   # output, 2 bufs
        inter = (n * H8 * Wl * 2          # bf16 copy of the input block
                 + n * H8 * Wp * 4        # f32 column-interp result
                 + n * H8 * Wp * 2        # bf16 recast of it
                 + _round_up(Kp, 8) * Wp * 4)
        return inp + outb + wts_bytes + inter

    # Generation-aware VMEM capacity (64 MiB per TensorCore on v7x).
    try:
        vmem_cap = int(pltpu.get_tpu_info().vmem_capacity_bytes)
    except Exception:
        vmem_cap = 64 * 1024 * 1024

    # Pick the batch block: largest divisor of B that fits comfortably in VMEM
    # while keeping >= 2 grid steps so the "parallel" axis can still split
    # across v7x's two TensorCores.
    Bt = 1
    for bt in sorted((d for d in range(1, B + 1) if B % d == 0), reverse=True):
        if B >= 2 and B // bt < 2:
            continue
        if _vmem_estimate(bt) <= 0.45 * vmem_cap:
            Bt = bt
            break

    vmem_limit = int(min(max(2 * _vmem_estimate(Bt), 32 * 1024 * 1024),
                         int(0.85 * vmem_cap)))

    big_m = (H % 8 == 0)
    kernel = _make_kernel(Bt, C, H, W, crop_h_pad, crop_w_pad,
                          mean_f, inv_std_f, out_dtype, big_m)

    flops = 2 * B * C * (H * W * Wp + Kp * H * Wp)
    bytes_accessed = B * C * (H * W * 4 + Kp * Wp * out_itemsize) + wts_bytes

    out_padded = pl.pallas_call(
        kernel,
        out_shape=jax.ShapeDtypeStruct((B, C, crop_h_pad, crop_w_pad), out_dtype),
        grid_spec=pltpu.PrefetchScalarGridSpec(
            num_scalar_prefetch=0,
            grid=(B // Bt,),
            in_specs=[
                pl.BlockSpec((Bt, C, H, W), lambda b: (b, 0, 0, 0)),
                # Interpolation matrices are grid-invariant: single buffer.
                pl.BlockSpec((crop_h_pad, H), lambda b: (0, 0),
                             pipeline_mode=pl.Buffered(1)),
                pl.BlockSpec((W, crop_w_pad), lambda b: (0, 0),
                             pipeline_mode=pl.Buffered(1)),
            ],
            out_specs=pl.BlockSpec((Bt, C, crop_h_pad, crop_w_pad),
                                   lambda b: (b, 0, 0, 0)),
        ),
        compiler_params=pltpu.CompilerParams(
            dimension_semantics=("parallel",),
            vmem_limit_bytes=vmem_limit,
        ),
        cost_estimate=pl.CostEstimate(
            flops=int(flops), transcendentals=0,
            bytes_accessed=int(bytes_accessed)),
    )(
        img.astype(jnp.float32),                 # f32 in; bf16 cast is in-kernel
        jnp.asarray(wh_pad, jnp.bfloat16),
        jnp.asarray(wwt_pad, jnp.bfloat16),
    )

    if pad_output:
        return out_padded
    return out_padded[..., :crop_h, :crop_w]


def _reference(img, wh_np, ww_np, mean, std):
    """Pure-JAX reference using the same bf16-rounded operands (f32 math)."""
    x = img.astype(jnp.bfloat16).astype(jnp.float32)
    wh = jnp.asarray(wh_np, jnp.bfloat16).astype(jnp.float32)
    ww = jnp.asarray(ww_np, jnp.bfloat16).astype(jnp.float32)
    y = jnp.einsum("kh,bchw,lw->bckl", wh, x, ww)
    m = jnp.asarray(mean, jnp.float32)[None, :, None, None]
    s = jnp.asarray(std, jnp.float32)[None, :, None, None]
    return (y - m) / s


if __name__ == "__main__":
    key = jax.random.PRNGKey(0)
    B, C, H, W = 2, 3, 32, 48          # small NCHW image batch, 3 channels
    img = jax.random.uniform(key, (B, C, H, W), dtype=jnp.float32)

    crop_size, resize_size = 36, 40    # shorter edge 32 -> 40, crop 36x36
    mean = (0.485, 0.456, 0.406)
    std = (0.229, 0.224, 0.225)

    out = image_classification_forward(
        img, crop_size=crop_size, resize_size=resize_size, mean=mean, std=std)
    out = jax.block_until_ready(out)

    assert out.shape == (B, C, crop_size, crop_size)
    assert out.dtype == jnp.float32

    # Sanity check against a pure-JAX reference built from the same matrices.
    new_h, new_w = _resize_output_size(H, W, resize_size)
    top = int(round((new_h - crop_size) / 2.0))
    left = int(round((new_w - crop_size) / 2.0))
    wh_np = _bilinear_resize_matrix_np(H, new_h)[top: top + crop_size]
    ww_np = _bilinear_resize_matrix_np(W, new_w)[left: left + crop_size]
    ref = _reference(img, wh_np, ww_np, mean, std)
    err = float(jnp.max(jnp.abs(out - ref)))
    assert err < 5e-2, f"max abs error {err} too large"

    print("KERNEL_OK")
</pallas_src>

<mosaic_0001>
module attributes {stable_mosaic.version = 11 : i64} {
  func.func @kernel(%arg0: i32, %arg1: memref<1x3x32x48xf32, #tpu.memory_space<vmem>>, %arg2: memref<40x32xbf16, #tpu.memory_space<vmem>>, %arg3: memref<48x128xbf16, #tpu.memory_space<vmem>>, %arg4: memref<1x3x40x128xf32, #tpu.memory_space<vmem>>) attributes {dimension_semantics = [#tpu.dimension_semantics<parallel>], iteration_bounds = array<i64: 2>, scalar_prefetch = 0 : i64, scratch_operands = 0 : i64, tpu.core_type = #tpu.core_type<tc>, window_params = [{transform_indices = @transform_0, window_bounds = array<i64: 1, 3, 32, 48>}, {pipeline_mode = #tpu.pipeline_mode<synchronous>, transform_indices = @transform_1, window_bounds = array<i64: 40, 32>}, {pipeline_mode = #tpu.pipeline_mode<synchronous>, transform_indices = @transform_2, window_bounds = array<i64: 48, 128>}, {transform_indices = @transform_3, window_bounds = array<i64: 1, 3, 40, 128>}]} {
    %c0 = arith.constant 0 : index
    %c0_0 = arith.constant 0 : index
    %0 = vector.load %arg2[%c0, %c0_0] : memref<40x32xbf16, #tpu.memory_space<vmem>>, vector<40x32xbf16>
    %c0_1 = arith.constant 0 : index
    %c0_2 = arith.constant 0 : index
    %1 = vector.load %arg3[%c0_1, %c0_2] : memref<48x128xbf16, #tpu.memory_space<vmem>>, vector<48x128xbf16>
    %c0_3 = arith.constant 0 : index
    %c0_4 = arith.constant 0 : index
    %c0_5 = arith.constant 0 : index
    %c0_6 = arith.constant 0 : index
    %2 = vector.load %arg1[%c0_3, %c0_4, %c0_5, %c0_6] : memref<1x3x32x48xf32, #tpu.memory_space<vmem>>, vector<1x3x32x48xf32>
    %3 = vector.shape_cast %2 : vector<1x3x32x48xf32> to vector<96x48xf32>
    %4 = arith.truncf %3 : vector<96x48xf32> to vector<96x48xbf16>
    %cst = arith.constant dense<0.000000e+00> : vector<96x128xf32>
    %5 = tpu.matmul %4, %1, %cst {dimension_numbers = #tpu.dot_dimension_numbers<[1], [0], [0], [1], [0, 0, 1, 1], [], []>} : vector<96x48xbf16>, vector<48x128xbf16>, vector<96x128xf32> -> vector<96x128xf32>
    %6 = vector.extract_strided_slice %5 {offsets = [0, 0], sizes = [32, 128], strides = [1, 1]} : vector<96x128xf32> to vector<32x128xf32>
    %7 = arith.truncf %6 : vector<32x128xf32> to vector<32x128xbf16>
    %cst_7 = arith.constant dense<0.000000e+00> : vector<40x128xf32>
    %8 = tpu.matmul %0, %7, %cst_7 {dimension_numbers = #tpu.dot_dimension_numbers<[1], [0], [0], [1], [0, 0, 1, 1], [], []>} : vector<40x32xbf16>, vector<32x128xbf16>, vector<40x128xf32> -> vector<40x128xf32>
    %cst_8 = arith.constant 4.850000e-01 : f32
    %9 = vector.broadcast %cst_8 : f32 to vector<40x128xf32>
    %10 = arith.subf %8, %9 : vector<40x128xf32>
    %cst_9 = arith.constant 4.36681223 : f32
    %11 = vector.broadcast %cst_9 : f32 to vector<40x128xf32>
    %12 = arith.mulf %10, %11 : vector<40x128xf32>
    %c0_10 = arith.constant 0 : index
    %c0_11 = arith.constant 0 : index
    %c0_12 = arith.constant 0 : index
    %c0_13 = arith.constant 0 : index
    %13 = vector.load %arg4[%c0_10, %c0_11, %c0_12, %c0_13] : memref<1x3x40x128xf32, #tpu.memory_space<vmem>>, vector<1x1x40x128xf32>
    %14 = vector.shape_cast %13 : vector<1x1x40x128xf32> to vector<40x128xf32>
    %15 = vector.shape_cast %12 : vector<40x128xf32> to vector<1x1x40x128xf32>
    tpu.vector_store %arg4[%c0_10, %c0_11, %c0_12, %c0_13], %15 {strides = array<i32>} : memref<1x3x40x128xf32, #tpu.memory_space<vmem>>, vector<1x1x40x128xf32>,
    %16 = vector.extract_strided_slice %5 {offsets = [32, 0], sizes = [32, 128], strides = [1, 1]} : vector<96x128xf32> to vector<32x128xf32>
    %17 = arith.truncf %16 : vector<32x128xf32> to vector<32x128xbf16>
    %cst_14 = arith.constant dense<0.000000e+00> : vector<40x128xf32>
    %18 = tpu.matmul %0, %17, %cst_14 {dimension_numbers = #tpu.dot_dimension_numbers<[1], [0], [0], [1], [0, 0, 1, 1], [], []>} : vector<40x32xbf16>, vector<32x128xbf16>, vector<40x128xf32> -> vector<40x128xf32>
    %cst_15 = arith.constant 4.560000e-01 : f32
    %19 = vector.broadcast %cst_15 : f32 to vector<40x128xf32>
    %20 = arith.subf %18, %19 : vector<40x128xf32>
    %cst_16 = arith.constant 4.46428585 : f32
    %21 = vector.broadcast %cst_16 : f32 to vector<40x128xf32>
    %22 = arith.mulf %20, %21 : vector<40x128xf32>
    %c0_17 = arith.constant 0 : index
    %c1 = arith.constant 1 : index
    %c0_18 = arith.constant 0 : index
    %c0_19 = arith.constant 0 : index
    %23 = vector.load %arg4[%c0_17, %c1, %c0_18, %c0_19] : memref<1x3x40x128xf32, #tpu.memory_space<vmem>>, vector<1x1x40x128xf32>
    %24 = vector.shape_cast %23 : vector<1x1x40x128xf32> to vector<40x128xf32>
    %25 = vector.shape_cast %22 : vector<40x128xf32> to vector<1x1x40x128xf32>
    tpu.vector_store %arg4[%c0_17, %c1, %c0_18, %c0_19], %25 {strides = array<i32>} : memref<1x3x40x128xf32, #tpu.memory_space<vmem>>, vector<1x1x40x128xf32>,
    %26 = vector.extract_strided_slice %5 {offsets = [64, 0], sizes = [32, 128], strides = [1, 1]} : vector<96x128xf32> to vector<32x128xf32>
    %27 = arith.truncf %26 : vector<32x128xf32> to vector<32x128xbf16>
    %cst_20 = arith.constant dense<0.000000e+00> : vector<40x128xf32>
    %28 = tpu.matmul %0, %27, %cst_20 {dimension_numbers = #tpu.dot_dimension_numbers<[1], [0], [0], [1], [0, 0, 1, 1], [], []>} : vector<40x32xbf16>, vector<32x128xbf16>, vector<40x128xf32> -> vector<40x128xf32>
    %cst_21 = arith.constant 4.060000e-01 : f32
    %29 = vector.broadcast %cst_21 : f32 to vector<40x128xf32>
    %30 = arith.subf %28, %29 : vector<40x128xf32>
    %cst_22 = arith.constant 4.44444466 : f32
    %31 = vector.broadcast %cst_22 : f32 to vector<40x128xf32>
    %32 = arith.mulf %30, %31 : vector<40x128xf32>
    %c0_23 = arith.constant 0 : index
    %c2 = arith.constant 2 : index
    %c0_24 = arith.constant 0 : index
    %c0_25 = arith.constant 0 : index
    %33 = vector.load %arg4[%c0_23, %c2, %c0_24, %c0_25] : memref<1x3x40x128xf32, #tpu.memory_space<vmem>>, vector<1x1x40x128xf32>
    %34 = vector.shape_cast %33 : vector<1x1x40x128xf32> to vector<40x128xf32>
    %35 = vector.shape_cast %32 : vector<40x128xf32> to vector<1x1x40x128xf32>
    tpu.vector_store %arg4[%c0_23, %c2, %c0_24, %c0_25], %35 {strides = array<i32>} : memref<1x3x40x128xf32, #tpu.memory_space<vmem>>, vector<1x1x40x128xf32>,
    return
  }
  func.func @transform_0(%arg0: i32) -> (i32, i32, i32, i32) {
    %c0_i32 = arith.constant 0 : i32
    %c0_i32_0 = arith.constant 0 : i32
    %c0_i32_1 = arith.constant 0 : i32
    %c0_i32_2 = arith.constant 0 : i32
    return %arg0, %c0_i32, %c0_i32_0, %c0_i32_1 : i32, i32, i32, i32
  }
  func.func @transform_1(%arg0: i32) -> (i32, i32) {
    %c0_i32 = arith.constant 0 : i32
    %c0_i32_0 = arith.constant 0 : i32
    %c0_i32_1 = arith.constant 0 : i32
    return %c0_i32, %c0_i32_0 : i32, i32
  }
  func.func @transform_2(%arg0: i32) -> (i32, i32) {
    %c0_i32 = arith.constant 0 : i32
    %c0_i32_0 = arith.constant 0 : i32
    %c0_i32_1 = arith.constant 0 : i32
    return %c0_i32, %c0_i32_0 : i32, i32
  }
  func.func @transform_3(%arg0: i32) -> (i32, i32, i32, i32) {
    %c0_i32 = arith.constant 0 : i32
    %c0_i32_0 = arith.constant 0 : i32
    %c0_i32_1 = arith.constant 0 : i32
    %c0_i32_2 = arith.constant 0 : i32
    return %arg0, %c0_i32, %c0_i32_0, %c0_i32_1 : i32, i32, i32, i32
  }
}

</mosaic_0001>

<bundles_post_ra>
// kernel: tpu_custom_call.1
= control target key start
LH: loop header
LB: loop body
LE: loop exit
PB: predicated region body
PF: predicated region fallthrough
CT: control target
= control target key end

     0   :  { %8 = vsyncpa [#allocation3], 0  ;;  %s1232_s0 = inlined_call_operand.hbm [shape: f32[2,3,32,48], index: 0, kind: input, shape index: {}]   ;;  %s1233_s1 = inlined_call_operand.vmem [shape: bf16[40,32], index: 1, kind: input, shape index: {}]   ;;  %s1234_s2 = inlined_call_operand.vmem [shape: bf16[48,128], index: 2, kind: input, shape index: {}]   ;;  %s1235_s3 = inlined_call_operand.hbm [shape: f32[2,3,40,128], index: 3, kind: output, shape index: {}]  }
   0x1   :  { %10 = vsyncpa [#allocation3 + $0x1], 0 }
   0x2   :  { %11 = vsyncpa [#allocation4], 0 }
   0x3   :  { %13 = vsyncpa [#allocation4 + $0x1], 0  ;;  %s1001_s12 = smov 0   ;;  %s1003_s13 = smov 0  }
   0x4   :  { %s1005_s14 = smov 0   ;;  %s1007_s15 = smov 0  }
   0x5 LB: > { %s1022_s16 = sadd.s32 4294967295, %s971_s15   ;;  %s668_s17 = sadd.s32 4294967294, %s971_s15   ;;  %s971_s15 = sphi %s1007_s15, %s1247_s15   ;;  %s967_s14 = sphi %s1005_s14, %s1246_s14   ;;  %s963_s13 = sphi %s1003_s13, %s1245_s13   ;;  %s959_s12 = sphi %s1001_s12, %s1244_s12  }
   0x6   : > { %s1026_s18 = sadd.s32 1, %s971_s15   ;;  %s26_s19 = sadd.s32 1, %s967_s14 }
   0x7   : > { %s23_s20 = ssub.s32 %s971_s15, %s1026_s18  ;;  %p33_p0 = scmp.ne.s32.totalorder %s967_s14, %s963_s13 }
   0x8   : > { %p24_p1 = scmp.eq.s32.totalorder %s23_s20, 0  ;;  %p34_p2 = scmp.eq.s32.totalorder %s971_s15, 0 }
   0x9   : > { %p39_p3 = scmp.ne.s32.totalorder %s963_s13, %s959_s12  ;;  %p40_p4 = scmp.eq.s32.totalorder %s1022_s16, 0 }
   0xa   : > { %s1038_s21 = scalar_select %p24_p1, %s967_s14, %s26_s19  }
   0xb   : > { %p35_p5 = por %p34_p2, %p33_p0  ;;  %p1040_p6 = por %p40_p4, %p39_p3 }
   0xc   : > { %p105_p7 = scmp.eq.s32.totalorder %s1022_s16, 1  ;;  %p111_p8 = scmp.eq.s32.totalorder %s668_s17, 1 }
   0xd   : > { %p829_p10 = scmp.lt.s32.totalorder %s971_s15, 2  ;;  %s137_s25 = sand.u32 1, %s967_s14  }
   0xe   : > { %p1047_p11 = por %p105_p7, %p33_p0  ;;  %p1051_p12 = por %p111_p8, %p39_p3 }
   0xf   : > { %s813_s26 = smul.u32 1536, %s971_s15  ;;  %p1062_p13 = pnand %p829_p10, %p35_p5 }
  0x10   : > { %s1238_s23 = scalar_select %p1047_p11, 1, 0 }
  0x11   : > { %s1239_s24 = scalar_select %p1051_p12, 1, 0 }
  0x12   : > { %s812_s27 = smul.u32 96, %s137_s25  ;;  %s1060_s30 = scalar_lea.hbm %s1232_s0, %s813_s26 }
  0x13   : > { %s1068_s7 = scalar_lea.sflag [#allocation3], %s137_s25  ;;  %s875_s8 = scalar_lea.hbm %s1060_s30, 1536 }
  0x14   : > { %s141_s5 = scalar_lea.vmem [#allocation2], %s812_s27  ;;  %p876_p0 = scmp.ne.s32.totalorder %s1060_s30, %s875_s8 }
  0x15   : > { %s148_s6 = sshll.u32 %s141_s5, 4  ;;  %p877_p1 = pneg %p1062_p13  ;;  %s1066_s6 = int_to_ptr.vmem [resolvable:$true] %s148_s6 }
  0x16   : > { %s880_s11 = scalar_lea.hbm %s1232_s0, 3072  ;;  %p881_p4 = scmp.lt.u32.totalorder %s1060_s30, %s1232_s0 }
  0x17   : > { %p878_p2 = pnand %p877_p1, %p876_p0  ;;  %p882_p5 = scmp.lt.u32.totalorder %s880_s11, %s875_s8 }
  0x18   : > { %p884_p8 = scmp.lt.u32.totalorder %s875_s8, %s1060_s30 }
  0x19   : > { %p879_p3 = pneg %p878_p2  ;;  %p883_p7 = por %p882_p5, %p881_p4 }
  0x1b   : > { %p885_p10 = por %p884_p8, %p883_p7 }
  0x1d   : > { %p886_p9 = pnand %p885_p10, %p879_p3 }
  0x1f   : > { %889 = shalt.err (!%p886_p9)
}
  0x20   : > { %s890_s20 = scalar_lea.vmem %s1066_s6, 1536  ;;  %s973_s25 = smov [#allocation2]  }
  0x21   : > { %p891_p0 = scmp.ne.s32.totalorder %s1066_s6, %s890_s20  ;;  %s895_s26 = sshll.u32 %s973_s25, 4  ;;  %s896_s26 = int_to_ptr.vmem [resolvable:$false] %s895_s26 }
  0x22   : > { %s897_s27 = scalar_lea.vmem %s896_s26, 3072  ;;  %p898_p11 = scmp.lt.s32.totalorder %s1066_s6, %s896_s26 }
  0x23   : > { %p893_p2 = pnand %p891_p0, %p877_p1  ;;  %p899_p4 = scmp.lt.s32.totalorder %s897_s27, %s890_s20 }
  0x25   : > { %p894_p12 = pneg %p893_p2  ;;  %p900_p5 = por %p899_p4, %p898_p11 }
  0x27   : > { %p901_p7 = pnand %p900_p5, %p894_p12 }
  0x29   : > { %904 = shalt.err (!%p901_p7)
}
  0x2a   : > { %s974_s28 = smov 128   ;;  %s975_s29 = smov 8  }
  0x2b   : > { %824 = dma.hbm_to_vmem [thread:$0]  (!%p1062_p13), %s1060_s30, 1536, %s1066_s6, %s1068_s7, %s974_s28, %s974_s28, %s975_s29  }
  0x2c   : > { %p672_p9 = scmp.ge.s32.totalorder %s971_s15, 1  ;;  %p156_p1 = scmp.lt.s32.totalorder %s971_s15, 3 }
  0x2e   : > { %p157_p3 = pnand %p672_p9, %p156_p1 }
  0x2f   : > { %s1099_s5 = sand.u32 (!%p157_p3), 1, %s963_s13  }
  0x30   : > { %160 = sbr.rel (%p157_p3) target bundleno = 564 (0x234), region = 32  ;;  %s163_s9 = scalar_lea.sflag (!%p157_p3), [#allocation3], %s1099_s5 }
  0x31   : > { %s814_s8 = smul.u32 (!%p157_p3), 96, %s1099_s5 }
  0x33   : > { %s1103_s10 = scalar_lea.vmem (!%p157_p3), [#allocation2], %s814_s8 }
  0x37   : > { %950 = dma.done.wait (%p1040_p6), %s163_s9, 1536  }
  0x38   : > { %952 = vsyncadd (%p1040_p6), %s163_s9, 4294965760  ;;  %v869_v0 = vld [vmem:[%s1234_s2] sm:$0xff]   ;;  %v870_v1 = vld [vmem:[%s1234_s2 + $0x8] sm:$0xff]   ;;  %vm237_vm0 = vcmask 392192   ;;  %v976_v21 = vmov 0.0   ;;  %vm977_vm1 = vmmov 0  }
  0x39   : > { %746 = vmatprep.subr.bf16.mxu0 %v869_v0  ;;  %v201_v2 = vld [vmem:[%s1103_s10] sm:$0xff]  ;;  %v202_v3 = vld [vmem:[%s1103_s10 + $0x8] sm:$0xff]  ;;  %v871_v4 = vld [vmem:[%s1234_s2 + $0x10] sm:$0xff]   ;;  %764 = vmatprep.subr.bf16.mxu1 %v976_v21  ;;  %vm352_vm2 = vcmask 261120   ;;  %s815_s28 = smul.u32 120, %s1099_s5  ;;  %p1241_p11 = scmp.ne.s32.totalorder %s1238_s23, 0 }
  0x3a   : > { %747 = vmatpush3.bf16.msra.mxu0 %v869_v0  ;;  %v213_v5 = vpack.c.bf16 %v202_v3, %v201_v2  ;;  %v203_v6 = vld [vmem:[%s1103_s10 + $0x10] sm:$0xff]  ;;  %v204_v7 = vld [vmem:[%s1103_s10 + $0x18] sm:$0xff]  ;;  %v205_v8 = vld [vmem:[%s1103_s10 + $0x20] sm:$0xff]  ;;  %768 = vmatprep.mubr.msk.bf16.mxu1 %vm977_vm1, %v976_v21  ;;  %s816_s8 = smul.u32 1920, %s1022_s16  ;;  %s582_s16 = scalar_lea.sflag [#allocation4], %s1099_s5 }
  0x3b   : > { %748 = vmatprep.subr.bf16.mxu0 %v870_v1  ;;  %v206_v9 = vld [vmem:[%s1103_s10 + $0x28] sm:$0xff]  ;;  %v214_v10 = vpack.c.bf16 %v204_v7, %v203_v6  ;;  %v207_v12 = vld [vmem:[%s1103_s10 + $0x30] sm:$0xff]  ;;  %v208_v13 = vld [vmem:[%s1103_s10 + $0x38] sm:$0xff]  ;;  %s1164_s29 = scalar_lea.vmem [#allocation5], %s815_s28  ;;  %s978_s7 = smov [#allocation5]  }
  0x3c   : > { %752 = vmatprep.mubr.msk.bf16.mxu0 %vm237_vm0, %v213_v5  ;;  %v215_v11 = vpack.c.bf16 %v206_v9, %v205_v8  ;;  %v209_v14 = vld [vmem:[%s1103_s10 + $0x40] sm:$0xff]  ;;  %v210_v15 = vld [vmem:[%s1103_s10 + $0x48] sm:$0xff]  ;;  %v216_v16 = vpack.c.bf16 %v208_v13, %v207_v12  ;;  %v211_v18 = vld [vmem:[%s1103_s10 + $0x50] sm:$0xff]  ;;  %s595_s9 = sshll.u32 %s1164_s29, 4  ;;  %s1185_s4 = scalar_lea.hbm %s1235_s3, %s816_s8  ;;  %s1187_s9 = int_to_ptr.vmem [resolvable:$true] %s595_s9 }
  0x3d   : > { %v217_v17 = vpack.c.bf16 %v210_v15, %v209_v14  ;;  %v212_v19 = vld [vmem:[%s1103_s10 + $0x58] sm:$0xff]  ;;  %v872_v30 = vld [vmem:[%s1233_s1] sm:$0xff]   ;;  %v873_v37 = vld [vmem:[%s1233_s1 + $0x8] sm:$0xff]   ;;  %s905_s6 = scalar_lea.vmem %s1187_s9, 1920  ;;  %s909_s22 = sshll.u32 %s978_s7, 4  ;;  %s910_s22 = int_to_ptr.vmem [resolvable:$false] %s909_s22 }
  0x3e   : > { %749 = vmatpush3.bf16.msra.mxu0 %v870_v1  ;;  %v218_v20 = vpack.c.bf16 %v212_v19, %v211_v18  ;;  %v874_v42 = vld [vmem:[%s1233_s1 + $0x10] ss:$0 sps:$4 sm:$0xff]   ;;  %p906_p6 = scmp.ne.s32.totalorder %s1187_s9, %s905_s6  ;;  %s911_s11 = scalar_lea.vmem %s910_s22, 3840 }
  0x3f   : > { %750 = vmatprep.subr.bf16.mxu0 %v871_v4  ;;  %p912_p8 = scmp.lt.s32.totalorder %s1187_s9, %s910_s22  ;;  %p913_p10 = scmp.lt.s32.totalorder %s911_s11, %s905_s6 }
  0x40   : > { %p907_p12 = pnand %p906_p6, %p1241_p11 }
  0x41   : > { %p914_p0 = por %p913_p10, %p912_p8 }
  0x42   : > { %751 = vmatpush3.bf16.msra.mxu0 %v871_v4  ;;  %p908_p13 = pneg %p907_p12 }
  0x43   : > { %796 = vmatprep.subr.bf16.mxu0 %v976_v21 }
  0x44   : > { %p915_p2 = pnand %p914_p0, %p908_p13 }
  0x45   : > { %753 = vmatmul.mubr.msk.bf16.vlgmr.msra.gmra.mrb[0].mxu0 %vm237_vm0, %v214_v10 }
  0x46   : > { %756 = vmatprep.mubr.msk.bf16.mxu0 %vm237_vm0, %v215_v11 }
  0x4d   : > { %757 = vmatmul.mubr.msk.bf16.gmra.mrb[4].mxu0 %vm237_vm0, %v216_v16 }
  0x4e   : > { %760 = vmatprep.mubr.msk.bf16.mxu0 %vm237_vm0, %v217_v17 }
  0x55   : > { %761 = vmatmul.mubr.msk.bf16.gmra.mrb[8].mxu0 %vm237_vm0, %v218_v20 }
  0x56   : > { %800 = vmatprep.mubr.msk.bf16.mxu0 %vm977_vm1, %v976_v21 }
 0x118   : > { %v754_v22 = vpop.f32.mrb[0].mxu0 }
 0x119   : > { %v290_v23 = vpop.f32.mrb[1].mxu0 }
 0x11a   : > { %v755_v24 = vpop.f32.mrb[2].mxu0 }
 0x11b   : > { %v338_v25 = vpack.c.bf16 %v755_v24, %v754_v22  ;;  %v293_v26 = vpop.f32.mrb[3].mxu0 }
 0x11c   : > { %v337_v27 = vpack.c.bf16 %v293_v26, %v290_v23 }
 0x11e   : > { %765 = vmatpush3.bf16.msra.mxu1 %v337_v27 }
 0x11f   : > { %766 = vmatprep.subr.bf16.mxu1 %v976_v21 }
 0x120   : > { %v758_v28 = vpop.f32.mrb[4].mxu0 }
 0x121   : > { %v306_v29 = vpop.f32.mrb[5].mxu0 }
 0x122   : > { %v759_v31 = vpop.f32.mrb[6].mxu0  ;;  %767 = vmatpush3.bf16.msra.mxu1 %v338_v25 }
 0x123   : > { %v434_v32 = vpack.c.bf16 %v759_v31, %v758_v28  ;;  %v309_v33 = vpop.f32.mrb[7].mxu0  ;;  %780 = vmatprep.subr.bf16.mxu1 %v976_v21 }
 0x124   : > { %v433_v34 = vpack.c.bf16 %v309_v33, %v306_v29 }
 0x125   : > { %769 = vmatmul.mubr.msk.bf16.vlgmr.msra.gmra.mrb[0].mxu1 %vm352_vm2, %v872_v30 }
 0x126   : > { %781 = vmatpush3.bf16.msra.mxu1 %v433_v34  ;;  %772 = vmatprep.mubr.msk.bf16.mxu1 %vm977_vm1, %v976_v21 }
 0x127   : > { %782 = vmatprep.subr.bf16.mxu1 %v976_v21 }
 0x128   : > { %v762_v35 = vpop.f32.mrb[8].mxu0 }
 0x129   : > { %v322_v36 = vpop.f32.mrb[9].mxu0 }
 0x12a   : > { %v763_v38 = vpop.f32.mrb[10].mxu0  ;;  %783 = vmatpush3.bf16.msra.mxu1 %v434_v32 }
 0x12b   : > { %v508_v39 = vpack.c.bf16 %v763_v38, %v762_v35  ;;  %v325_v40 = vpop.f32.mrb[11].mxu0 }
 0x12c   : > { %v507_v41 = vpack.c.bf16 %v325_v40, %v322_v36 }
 0x12d   : > { %773 = vmatmul.mubr.msk.bf16.gmra.mrb[4].mxu1 %vm352_vm2, %v873_v37 }
 0x12e   : > { %797 = vmatpush3.bf16.msra.mxu0 %v507_v41  ;;  %776 = vmatprep.mubr.msk.bf16.mxu1 %vm977_vm1, %v976_v21 }
 0x12f   : > { %798 = vmatprep.subr.bf16.mxu0 %v976_v21 }
 0x132   : > { %799 = vmatpush3.bf16.msra.mxu0 %v508_v39 }
 0x135   : > { %777 = vmatmul.mubr.msk.bf16.gmra.mrb[8].mxu1 %vm352_vm2, %v874_v42  ;;  %801 = vmatmul.mubr.msk.bf16.vlgmr.msra.gmra.mrb[12].mxu0 %vm352_vm2, %v872_v30 }
 0x136   : > { %784 = vmatprep.mubr.msk.bf16.mxu1 %vm977_vm1, %v976_v21  ;;  %804 = vmatprep.mubr.msk.bf16.mxu0 %vm977_vm1, %v976_v21 }
 0x13d   : > { %785 = vmatmul.mubr.msk.bf16.vlgmr.msra.gmra.mrb[12].mxu1 %vm352_vm2, %v872_v30  ;;  %805 = vmatmul.mubr.msk.bf16.gmra.mrb[16].mxu0 %vm352_vm2, %v873_v37 }
 0x13e   : > { %788 = vmatprep.mubr.msk.bf16.mxu1 %vm977_vm1, %v976_v21  ;;  %808 = vmatprep.mubr.msk.bf16.mxu0 %vm977_vm1, %v976_v21 }
 0x145   : > { %789 = vmatmul.mubr.msk.bf16.gmra.mrb[16].mxu1 %vm352_vm2, %v873_v37  ;;  %809 = vmatmul.mubr.msk.bf16.gmra.mrb[20].mxu0 %vm352_vm2, %v874_v42 }
 0x146   : > { %792 = vmatprep.mubr.msk.bf16.mxu1 %vm977_vm1, %v976_v21 }
 0x14d   : > { %793 = vmatmul.mubr.msk.bf16.gmra.mrb[20].mxu1 %vm352_vm2, %v874_v42 }
 0x1f8   : > { %v396_v43 = vpop.f32.mrb[0].mxu1 }
 0x1f9   : > { %v688_v44 = vadd.f32 -0.485, %v396_v43  ;;  %v770_v45 = vpop.f32.mrb[1].mxu1 }
 0x1fa   : > { %v399_v46 = vpop.f32.mrb[2].mxu1 }
 0x1fb   : > { %v423_v47 = vmul.f32 4.366812, %v688_v44  ;;  %v689_v48 = vadd.f32 -0.485, %v399_v46  ;;  %v771_v49 = vpop.f32.mrb[3].mxu1 }
 0x1fd   : > { %428 = vst [vmem:[%s1164_s29] sm:$0xff] %v423_v47  ;;  %v424_v50 = vmul.f32 4.366812, %v689_v48 }
 0x1ff   : > { %429 = vst [vmem:[%s1164_s29 + $0x8] sm:$0xff] %v424_v50 }
 0x200   : > { %v404_v51 = vpop.f32.mrb[4].mxu1 }
 0x201   : > { %v690_v52 = vadd.f32 -0.485, %v404_v51  ;;  %v774_v53 = vpop.f32.mrb[5].mxu1 }
 0x202   : > { %v407_v54 = vpop.f32.mrb[6].mxu1 }
 0x203   : > { %v425_v55 = vmul.f32 4.366812, %v690_v52  ;;  %v691_v56 = vadd.f32 -0.485, %v407_v54  ;;  %v775_v57 = vpop.f32.mrb[7].mxu1 }
 0x205   : > { %430 = vst [vmem:[%s1164_s29 + $0x10] sm:$0xff] %v425_v55  ;;  %v426_v58 = vmul.f32 4.366812, %v691_v56 }
 0x207   : > { %431 = vst [vmem:[%s1164_s29 + $0x18] sm:$0xff] %v426_v58 }
 0x208   : > { %v412_v59 = vpop.f32.mrb[8].mxu1  ;;  %v543_v60 = vpop.f32.mrb[12].mxu0 }
 0x209   : > { %v692_v61 = vadd.f32 -0.485, %v412_v59  ;;  %v778_v62 = vpop.f32.mrb[9].mxu1  ;;  %v709_v63 = vadd.f32 -0.406, %v543_v60  ;;  %v802_v0 = vpop.f32.mrb[13].mxu0 }
 0x20a   : > { %v415_v1 = vpop.f32.mrb[10].mxu1  ;;  %v546_v2 = vpop.f32.mrb[14].mxu0 }
 0x20b   : > { %v427_v3 = vmul.f32 4.366812, %v692_v61  ;;  %v779_v4 = vpop.f32.mrb[11].mxu1  ;;  %v570_v5 = vmul.f32 4.4444447, %v709_v63  ;;  %v803_v6 = vpop.f32.mrb[15].mxu0 }
 0x20c   : > { %v710_v7 = vadd.f32 -0.406, %v546_v2 }
 0x20d   : > { %432 = vst [vmem:[%s1164_s29 + $0x20] sm:$0xff] %v427_v3  ;;  %714 = vst [vmem:[%s1164_s29 + $0x50] sm:$0xff] %v570_v5 }
 0x20e   : > { %v571_v8 = vmul.f32 4.4444447, %v710_v7 }
 0x210   : > { %v469_v9 = vpop.f32.mrb[12].mxu1  ;;  %715 = vst [vmem:[%s1164_s29 + $0x58] sm:$0xff] %v571_v8  ;;  %v551_v10 = vpop.f32.mrb[16].mxu0 }
 0x211   : > { %v696_v11 = vadd.f32 -0.456, %v469_v9  ;;  %v786_v12 = vpop.f32.mrb[13].mxu1  ;;  %v711_v13 = vadd.f32 -0.406, %v551_v10  ;;  %v806_v14 = vpop.f32.mrb[17].mxu0 }
 0x212   : > { %v472_v15 = vpop.f32.mrb[14].mxu1  ;;  %v554_v16 = vpop.f32.mrb[18].mxu0 }
 0x213   : > { %v496_v17 = vmul.f32 4.464286, %v696_v11  ;;  %v697_v18 = vadd.f32 -0.456, %v472_v15  ;;  %v787_v19 = vpop.f32.mrb[15].mxu1  ;;  %v807_v20 = vpop.f32.mrb[19].mxu0 }
 0x214   : > { %v572_v21 = vmul.f32 4.4444447, %v711_v13  ;;  %v712_v22 = vadd.f32 -0.406, %v554_v16 }
 0x215   : > { %701 = vst [vmem:[%s1164_s29 + $0x28] sm:$0xff] %v496_v17  ;;  %v497_v23 = vmul.f32 4.464286, %v697_v18 }
 0x216   : > { %716 = vst [vmem:[%s1164_s29 + $0x60] sm:$0xff] %v572_v21  ;;  %v573_v24 = vmul.f32 4.4444447, %v712_v22 }
 0x217   : > { %702 = vst [vmem:[%s1164_s29 + $0x30] sm:$0xff] %v497_v23 }
 0x218   : > { %v477_v25 = vpop.f32.mrb[16].mxu1  ;;  %717 = vst [vmem:[%s1164_s29 + $0x68] sm:$0xff] %v573_v24  ;;  %v559_v26 = vpop.f32.mrb[20].mxu0 }
 0x219   : > { %v698_v27 = vadd.f32 -0.456, %v477_v25  ;;  %v790_v28 = vpop.f32.mrb[17].mxu1  ;;  %v713_v29 = vadd.f32 -0.406, %v559_v26  ;;  %v810_v30 = vpop.f32.mrb[21].mxu0 }
 0x21a   : > { %v480_v31 = vpop.f32.mrb[18].mxu1  ;;  %v562_v32 = vpop.f32.mrb[22].mxu0 }
 0x21b   : > { %v498_v33 = vmul.f32 4.464286, %v698_v27  ;;  %v699_v34 = vadd.f32 -0.456, %v480_v31  ;;  %v791_v35 = vpop.f32.mrb[19].mxu1  ;;  %v811_v36 = vpop.f32.mrb[23].mxu0 }
 0x21c   : > { %v574_v37 = vmul.f32 4.4444447, %v713_v29 }
 0x21d   : > { %703 = vst [vmem:[%s1164_s29 + $0x38] sm:$0xff] %v498_v33  ;;  %v499_v38 = vmul.f32 4.464286, %v699_v34 }
 0x21e   : > { %718 = vst [vmem:[%s1164_s29 + $0x70] sm:$0xff] %v574_v37 }
 0x21f   : > { %704 = vst [vmem:[%s1164_s29 + $0x40] sm:$0xff] %v499_v38 }
 0x220   : > { %v485_v39 = vpop.f32.mrb[20].mxu1 }
 0x221   : > { %v700_v40 = vadd.f32 -0.456, %v485_v39  ;;  %v794_v41 = vpop.f32.mrb[21].mxu1 }
 0x222   : > { %v488_v42 = vpop.f32.mrb[22].mxu1 }
 0x223   : > { %v500_v43 = vmul.f32 4.464286, %v700_v40  ;;  %v795_v44 = vpop.f32.mrb[23].mxu1 }
 0x225   : > { %705 = vst [vmem:[%s1164_s29 + $0x48] sm:$0xff] %v500_v43 }
 0x226   : > { %918 = shalt.err (!%p915_p2)
}
 0x227   : > { %s919_s17 = scalar_lea.hbm %s1185_s4, 1920  ;;  %s923_s25 = scalar_lea.hbm %s1235_s3, 3840 }
 0x228   : > { %p920_p4 = scmp.ne.s32.totalorder %s1185_s4, %s919_s17  ;;  %p924_p9 = scmp.lt.u32.totalorder %s1185_s4, %s1235_s3 }
 0x229   : > { %p925_p1 = scmp.lt.u32.totalorder %s923_s25, %s919_s17  ;;  %p927_p6 = scmp.lt.u32.totalorder %s919_s17, %s1185_s4 }
 0x22a   : > { %p921_p5 = pnand %p920_p4, %p1241_p11 }
 0x22b   : > { %p926_p3 = por %p925_p1, %p924_p9 }
 0x22c   : > { %p922_p7 = pneg %p921_p5 }
 0x22d   : > { %p928_p12 = por %p927_p6, %p926_p3 }
 0x22f   : > { %p929_p13 = pnand %p928_p12, %p922_p7 }
 0x231   : > { %932 = shalt.err (!%p929_p13)
}
 0x232   : > { %s979_s28 = smov 128   ;;  %s980_s29 = smov 8  }
 0x233   : > { %819 = dma.vmem_to_hbm [thread:$0]  (%p1241_p11), %s1187_s9, 1920, %s1185_s4, %s582_s16, %s979_s28, %s979_s28, %s980_s29  }
 0x234 PF: > { %s610_s8 = sand.u32 1, %s959_s12   ;;  %p1242_p8 = scmp.ne.s32.totalorder %s1239_s24, 0 }
 0x235   : > { %p1243_p10 = scmp.ge.s32.totalorder %s971_s15, 2  ;;  %s611_s10 = scalar_lea.sflag [#allocation4], %s610_s8 }
 0x237   : > { %p826_p0 = pnand %p1243_p10, %p1242_p8 }
 0x239   : > { %954 = dma.done.wait (!%p826_p0), %s611_s10, 1920  }
 0x23a   : > { %956 = vsyncadd (!%p826_p0), %s611_s10, 4294965376  ;;  %p16_p2 = scmp.ge.s32.totalorder %s1026_s18, 4   ;;  %s1244_s12 = smov %s963_s13 }
 0x23b   : > { %s1245_s13 = smov %s967_s14  ;;  %s1246_s14 = smov %s1038_s21 }
 0x23c   : > { %s1247_s15 = smov %s1026_s18  ;;  %18 = sbr.rel (!%p16_p2) target bundleno = 5 (0x5), region = 79 }
 0x243   :  { %616 = vsyncpa [#allocation3], 1 }
 0x244   :  { %618 = vsyncpa [#allocation3 + $0x1], 1 }
 0x245   :  { %619 = vsyncpa [#allocation4], 1 }
 0x246   :  { %621 = vsyncpa [#allocation4 + $0x1], 1 }

</bundles_post_ra>
